<compile_context>
chip_gen: v7x
topology: tpu7x:2x2x1
jax: 0.10.0
libtpu: 0.0.40
codegen_flags: <defaults>
</compile_context>

<pallas_src>
import jax
import jax.numpy as jnp
from jax.experimental import pallas as pl
from jax.experimental.pallas import tpu as pltpu


def _round_up(n, m):
    return ((n + m - 1) // m) * m


def _pick_tile_b(B):
    """Batch tile: fill the MXU (M>=256 on v6e/v7x) but keep >=2 grid steps."""
    if B <= 128:
        return B            # one block; block dim == full array dim is legal
    for tb in (512, 256, 128):
        if B >= 2 * tb:
            return tb
    return 128


def regression_net_kernel(x_ref, w_ref, b_ref, out_ref):
    """One tile of batch rows: out = x @ W_fused + b_fused.

    x_ref  : (TB, Din)  input rows
    w_ref  : (Din, Op)  fused weight (W1^T @ W2^T), lane-padded, resident
    b_ref  : (1, Op)    fused bias   (b1 @ W2^T + b2), lane-padded, resident
    out_ref: (TB, Op)
    """
    out = (jnp.dot(x_ref[...], w_ref[...], preferred_element_type=jnp.float32)
           + b_ref[...])
    out_ref[...] = out.astype(out_ref.dtype)


def prepare_params(params):
    """One-time param prep: algebraic fc1*fc2 fusion + transpose + lane padding.

    Call this once at init and reuse the result for every forward call so the
    per-call path pays no pad/transpose XLA ops.
    """
    w1 = params["w1"].astype(jnp.float32)   # (H, Din)
    b1 = params["b1"].astype(jnp.float32)   # (H,)
    w2 = params["w2"].astype(jnp.float32)   # (O, H)
    b2 = params["b2"].astype(jnp.float32)   # (O,)

    # (x @ W1^T + b1) @ W2^T + b2  ==  x @ (W1^T @ W2^T) + (b1 @ W2^T + b2)
    w_fused = w1.T @ w2.T                   # (Din, O)
    b_fused = b1 @ w2.T + b2                # (O,)

    Din, O = w_fused.shape
    Op = _round_up(O, 128)                  # lane-dense output columns
    w_p = jnp.zeros((Din, Op), jnp.float32).at[:, :O].set(w_fused)
    b_p = jnp.zeros((1, Op), jnp.float32).at[:, :O].set(b_fused)
    return {"w": w_p, "b": b_p, "out_features": O}


def regression_net(x, fused, *, tile_b=None):
    """Forward pass with pre-fused params.  out = fc2(fc1(x))."""
    B, Din = x.shape
    w_p, b_p, O = fused["w"], fused["b"], fused["out_features"]
    Op = w_p.shape[1]

    if tile_b is None:
        tile_b = _pick_tile_b(B)
    grid = (pl.cdiv(B, tile_b),)            # trailing partial block is masked

    out = pl.pallas_call(
        regression_net_kernel,
        out_shape=jax.ShapeDtypeStruct((B, Op), jnp.float32),
        grid_spec=pltpu.PrefetchScalarGridSpec(
            num_scalar_prefetch=0,
            grid=grid,
            in_specs=[
                pl.BlockSpec((tile_b, Din), lambda i: (i, 0)),   # x tile
                pl.BlockSpec((Din, Op), lambda i: (0, 0)),       # fused W (resident)
                pl.BlockSpec((1, Op), lambda i: (0, 0)),         # fused b (resident)
            ],
            out_specs=pl.BlockSpec((tile_b, Op), lambda i: (i, 0)),
        ),
        compiler_params=pltpu.CompilerParams(
            dimension_semantics=("parallel",)),
    )(x, w_p, b_p)

    # Strip lane padding of the output features (cheap, done once).
    return out[:, :O]


if __name__ == "__main__":
    key = jax.random.PRNGKey(0)
    kx, kw1, kb1, kw2, kb2 = jax.random.split(key, 5)

    # Small shapes consistent with RegressionNet(input_size, hidden, output).
    B = 256
    input_size, hidden_size, output_size = 32, 64, 8

    x = jax.random.normal(kx, (B, input_size), jnp.float32)
    params = {
        "w1": 0.1 * jax.random.normal(kw1, (hidden_size, input_size), jnp.float32),
        "b1": 0.1 * jax.random.normal(kb1, (hidden_size,), jnp.float32),
        "w2": 0.1 * jax.random.normal(kw2, (output_size, hidden_size), jnp.float32),
        "b2": 0.1 * jax.random.normal(kb2, (output_size,), jnp.float32),
    }

    # One-time param prep (hoisted out of the per-call path).
    fused = prepare_params(params)
    fused = jax.tree_util.tree_map(
        lambda v: jax.block_until_ready(v) if isinstance(v, jax.Array) else v, fused)

    out = regression_net(x, fused)
    out = jax.block_until_ready(out)

    # Pure-JAX reference: x = fc1(x); x = fc2(x)
    ref = (x @ params["w1"].T + params["b1"]) @ params["w2"].T + params["b2"]
    assert out.shape == (B, output_size)
    # Algebraic fusion only changes f32 rounding order; stays well within tol.
    assert jnp.allclose(out, ref, atol=1e-5, rtol=1e-5)

    print("KERNEL_OK")
</pallas_src>

<mosaic_0001>
module attributes {stable_mosaic.version = 11 : i64} {
  func.func @regression_net_kernel(%arg0: i32, %arg1: memref<128x32xf32, #tpu.memory_space<vmem>>, %arg2: memref<32x128xf32, #tpu.memory_space<vmem>>, %arg3: memref<1x128xf32, #tpu.memory_space<vmem>>, %arg4: memref<128x128xf32, #tpu.memory_space<vmem>>) attributes {dimension_semantics = [#tpu.dimension_semantics<parallel>], iteration_bounds = array<i64: 2>, scalar_prefetch = 0 : i64, scratch_operands = 0 : i64, tpu.core_type = #tpu.core_type<tc>, window_params = [{transform_indices = @transform_0, window_bounds = array<i64: 128, 32>}, {pipeline_mode = #tpu.pipeline_mode<synchronous>, transform_indices = @transform_1, window_bounds = array<i64: 32, 128>}, {pipeline_mode = #tpu.pipeline_mode<synchronous>, transform_indices = @transform_2, window_bounds = array<i64: 1, 128>}, {transform_indices = @transform_3, window_bounds = array<i64: 128, 128>}]} {
    %c0 = arith.constant 0 : index
    %c0_0 = arith.constant 0 : index
    %0 = vector.load %arg1[%c0, %c0_0] : memref<128x32xf32, #tpu.memory_space<vmem>>, vector<128x32xf32>
    %c0_1 = arith.constant 0 : index
    %c0_2 = arith.constant 0 : index
    %1 = vector.load %arg2[%c0_1, %c0_2] : memref<32x128xf32, #tpu.memory_space<vmem>>, vector<32x128xf32>
    %cst = arith.constant dense<0.000000e+00> : vector<128x128xf32>
    %2 = tpu.matmul %0, %1, %cst {dimension_numbers = #tpu.dot_dimension_numbers<[1], [0], [0], [1], [0, 0, 1, 1], [], []>} : vector<128x32xf32>, vector<32x128xf32>, vector<128x128xf32> -> vector<128x128xf32>
    %c0_3 = arith.constant 0 : index
    %c0_4 = arith.constant 0 : index
    %3 = vector.load %arg3[%c0_3, %c0_4] : memref<1x128xf32, #tpu.memory_space<vmem>>, vector<1x128xf32>
    %4 = vector.broadcast %3 : vector<1x128xf32> to vector<128x128xf32>
    %5 = arith.addf %2, %4 : vector<128x128xf32>
    %c0_5 = arith.constant 0 : index
    %c0_6 = arith.constant 0 : index
    %6 = vector.load %arg4[%c0_5, %c0_6] : memref<128x128xf32, #tpu.memory_space<vmem>>, vector<128x128xf32>
    tpu.vector_store %arg4[%c0_5, %c0_6], %5 {strides = array<i32>} : memref<128x128xf32, #tpu.memory_space<vmem>>, vector<128x128xf32>,
    return
  }
  func.func @transform_0(%arg0: i32) -> (i32, i32) {
    %c0_i32 = arith.constant 0 : i32
    %c0_i32_0 = arith.constant 0 : i32
    return %arg0, %c0_i32 : i32, i32
  }
  func.func @transform_1(%arg0: i32) -> (i32, i32) {
    %c0_i32 = arith.constant 0 : i32
    %c0_i32_0 = arith.constant 0 : i32
    %c0_i32_1 = arith.constant 0 : i32
    return %c0_i32, %c0_i32_0 : i32, i32
  }
  func.func @transform_2(%arg0: i32) -> (i32, i32) {
    %c0_i32 = arith.constant 0 : i32
    %c0_i32_0 = arith.constant 0 : i32
    %c0_i32_1 = arith.constant 0 : i32
    return %c0_i32, %c0_i32_0 : i32, i32
  }
  func.func @transform_3(%arg0: i32) -> (i32, i32) {
    %c0_i32 = arith.constant 0 : i32
    %c0_i32_0 = arith.constant 0 : i32
    return %arg0, %c0_i32 : i32, i32
  }
}

</mosaic_0001>

<bundles_post_ra>
// kernel: tpu_custom_call.1
= control target key start
LH: loop header
LB: loop body
LE: loop exit
PB: predicated region body
PF: predicated region fallthrough
CT: control target
= control target key end

     0   :  { %8 = vsyncpa [#allocation3], 0  ;;  %s881_s0 = inlined_call_operand.vmem [shape: f32[256,32], index: 0, kind: input, shape index: {}]   ;;  %s882_s1 = inlined_call_operand.vmem [shape: f32[32,128], index: 1, kind: input, shape index: {}]   ;;  %s883_s2 = inlined_call_operand.vmem [shape: f32[1,128], index: 2, kind: input, shape index: {}]   ;;  %s884_s3 = inlined_call_operand.hbm [shape: f32[256,128], index: 3, kind: output, shape index: {}]  }
   0x1   :  { %10 = vsyncpa [#allocation3 + $0x1], 0  ;;  %s707_s12 = smov 0   ;;  %s709_s13 = smov 0  }
   0x2   :  { %s711_s14 = smov 0   ;;  %s713_s15 = smov 0  }
   0x3 LB: > { %s728_s16 = sadd.s32 4294967295, %s682_s15   ;;  %s485_s17 = sadd.s32 4294967294, %s682_s15   ;;  %s682_s15 = sphi %s713_s15, %s890_s15   ;;  %s678_s14 = sphi %s711_s14, %s889_s14   ;;  %s674_s13 = sphi %s709_s13, %s888_s13   ;;  %s670_s12 = sphi %s707_s12, %s887_s12  }
   0x4   : > { %s732_s18 = sadd.s32 1, %s682_s15   ;;  %s91_s19 = sadd.s32 1, %s678_s14 }
   0x5   : > { %s88_s20 = ssub.s32 %s682_s15, %s732_s18  ;;  %p101_p0 = scmp.ne.s32.totalorder %s678_s14, %s674_s13 }
   0x6   : > { %p89_p1 = scmp.eq.s32.totalorder %s88_s20, 0  ;;  %p102_p2 = scmp.eq.s32.totalorder %s728_s16, 1 }
   0x7   : > { %p107_p3 = scmp.ne.s32.totalorder %s674_s13, %s670_s12  ;;  %p108_p4 = scmp.eq.s32.totalorder %s485_s17, 1 }
   0x8   : > { %s743_s21 = scalar_select %p89_p1, %s678_s14, %s91_s19  }
   0x9   : > { %p745_p5 = por %p102_p2, %p101_p0  ;;  %p749_p6 = por %p108_p4, %p107_p3 }
   0xa   : > { %p488_p7 = scmp.ge.s32.totalorder %s682_s15, 1  ;;  %p141_p8 = scmp.lt.s32.totalorder %s682_s15, 3 }
   0xc   : > { %p142_p9 = pnand %p488_p7, %p141_p8 }
   0xd   : > { %v188_v0 = vld [vmem:[%s882_s1] sm:$0xff] (!%p142_p9)  ;;  %v189_v1 = vld [vmem:[%s882_s1 + $0x8] sm:$0xff] (!%p142_p9)  ;;  %v190_v2 = vld [vmem:[%s882_s1 + $0x10] sm:$0xff] (!%p142_p9)  ;;  %s490_s30 = sshll.u32 (!%p142_p9), %s728_s16, 4  ;;  %vm199_vm0 = vcmask (!%p142_p9), 261120   ;;  %s162_s10 = sand.u32 (!%p142_p9), 1, %s674_s13  }
   0xe   : > { %145 = sbr.rel (%p142_p9) target bundleno = 269 (0x10d), region = 32  ;;  %v567_v3 = vpack.c.bf16 (!%p142_p9), %v189_v1, %v188_v0  ;;  %v191_v4 = vld [vmem:[%s882_s1 + $0x18] sm:$0xff] (!%p142_p9)  ;;  %p166_p10 = scmp.lt.s32.totalorder (!%p142_p9), %s490_s30, 31  ;;  %v492_v22 = vld [vmem:[%s883_s2] ss:$0 sm:$0xff] (!%p142_p9) }
   0xf   : > { %v571_v5 = vpack.c.bf16 (!%p142_p9), %v191_v4, %v190_v2  ;;  %s489_s11 = sshll.u32 (!%p142_p9), %s162_s10, 7  ;;  %s514_s24 = sshll.u32 (!%p142_p9), %s728_s16, 11 }
  0x10   : > { %568 = vmatprep.subr.bf16.mxu0 (!%p142_p9), %v567_v3  ;;  %575 = vmatprep.subr.bf16.mxu1 (!%p142_p9), %v567_v3  ;;  %s811_s20 = scalar_lea.vmem (!%p142_p9), [#allocation2], %s489_s11  ;;  %s830_s16 = scalar_lea.hbm (!%p142_p9), %s884_s3, %s514_s24 }
  0x11   : > { %570 = vmatpush3.bf16.msra.mxu0 (!%p142_p9), %v567_v3  ;;  %577 = vmatpush3.bf16.msra.mxu1 (!%p142_p9), %v567_v3  ;;  %s423_s25 = sshll.u32 (!%p142_p9), %s811_s20, 4  ;;  %s840_s28 = scalar_lea.sflag (!%p142_p9), [#allocation3], %s162_s10  ;;  %s832_s25 = int_to_ptr.vmem [resolvable:$true] %s423_s25 }
  0x12   : > { %572 = vmatprep.subr.bf16.mxu0 (!%p142_p9), %v571_v5  ;;  %576 = vmatprep.subr.bf16.mxu1 (!%p142_p9), %v571_v5  ;;  %s620_s29 = scalar_lea.vmem (!%p142_p9), %s832_s25, 2048 }
  0x13   : > { %p621_p11 = scmp.ne.s32.totalorder (!%p142_p9), %s832_s25, %s620_s29 }
  0x15   : > { %s892_s30 = smov (!%p166_p10, %s490_s30), 31  ;;  %574 = vmatpush3.bf16.msra.mxu0 %v571_v5  ;;  %578 = vmatpush3.bf16.msra.mxu1 %v571_v5  ;;  %p622_p12 = pnand %p621_p11, %p745_p5 }
  0x16   : > { %s491_s6 = sshll.u32 %s892_s30, 3  ;;  %s684_s30 = smov [#allocation2]  }
  0x17   : > { %s771_s9 = scalar_lea.vmem %s881_s0, %s491_s6  ;;  %p623_p13 = pneg %p622_p12 }
  0x18   : > { %v172_v6 = vld [vmem:[%s771_s9] sm:$0xff]  ;;  %v173_v8 = vld [vmem:[%s771_s9 + $0x8] sm:$0xff]  ;;  %v174_v10 = vld [vmem:[%s771_s9 + $0x10] sm:$0xff]  ;;  %s624_s4 = sshll.u32 %s684_s30, 4  ;;  %s625_s4 = int_to_ptr.vmem [resolvable:$false] %s624_s4 }
  0x19   : > { %v180_v7 = vld [vmem:[%s771_s9 + $0x40] sm:$0xff]  ;;  %v181_v9 = vld [vmem:[%s771_s9 + $0x48] sm:$0xff]  ;;  %543 = vmatprep.mubr.msk.f32.mxu0 %vm199_vm0, %v172_v6  ;;  %v182_v11 = vld [vmem:[%s771_s9 + $0x50] sm:$0xff]  ;;  %s626_s5 = scalar_lea.vmem %s625_s4, 4096  ;;  %p627_p0 = scmp.lt.s32.totalorder %s832_s25, %s625_s4 }
  0x1a   : > { %555 = vmatprep.mubr.msk.f32.mxu1 %vm199_vm0, %v180_v7  ;;  %544 = vmatmul.mubr.msk.f32.vlgmr.msra.gmra.mrb[0].mxu0 %vm199_vm0, %v173_v8  ;;  %v175_v12 = vld [vmem:[%s771_s9 + $0x18] sm:$0xff]  ;;  %v176_v14 = vld [vmem:[%s771_s9 + $0x20] sm:$0xff]  ;;  %v177_v16 = vld [vmem:[%s771_s9 + $0x28] sm:$0xff]  ;;  %p628_p1 = scmp.lt.s32.totalorder %s626_s5, %s620_s29 }
  0x1b   : > { %556 = vmatmul.mubr.msk.f32.vlgmr.msra.gmra.mrb[0].mxu1 %vm199_vm0, %v181_v9  ;;  %546 = vmatprep.mubr.msk.f32.mxu0 %vm199_vm0, %v174_v10  ;;  %v183_v13 = vld [vmem:[%s771_s9 + $0x58] sm:$0xff]  ;;  %v184_v15 = vld [vmem:[%s771_s9 + $0x60] sm:$0xff]  ;;  %v185_v17 = vld [vmem:[%s771_s9 + $0x68] sm:$0xff] }
  0x1c   : > { %558 = vmatprep.mubr.msk.f32.mxu1 %vm199_vm0, %v182_v11  ;;  %v178_v18 = vld [vmem:[%s771_s9 + $0x30] sm:$0xff]  ;;  %v179_v20 = vld [vmem:[%s771_s9 + $0x38] sm:$0xff]  ;;  %p629_p2 = por %p628_p1, %p627_p0 }
  0x1d   : > { %v186_v19 = vld [vmem:[%s771_s9 + $0x70] sm:$0xff]  ;;  %v187_v21 = vld [vmem:[%s771_s9 + $0x78] sm:$0xff] }
  0x1e   : > { %547 = vmatmul.mubr.msk.f32.gmra.mrb[2].mxu0 %vm199_vm0, %v175_v12  ;;  %p630_p3 = pnand %p629_p2, %p623_p13 }
  0x1f   : > { %559 = vmatmul.mubr.msk.f32.gmra.mrb[2].mxu1 %vm199_vm0, %v183_v13  ;;  %549 = vmatprep.mubr.msk.f32.mxu0 %vm199_vm0, %v176_v14 }
  0x20   : > { %561 = vmatprep.mubr.msk.f32.mxu1 %vm199_vm0, %v184_v15 }
  0x22   : > { %550 = vmatmul.mubr.msk.f32.gmra.mrb[4].mxu0 %vm199_vm0, %v177_v16 }
  0x23   : > { %562 = vmatmul.mubr.msk.f32.gmra.mrb[4].mxu1 %vm199_vm0, %v185_v17  ;;  %552 = vmatprep.mubr.msk.f32.mxu0 %vm199_vm0, %v178_v18 }
  0x24   : > { %564 = vmatprep.mubr.msk.f32.mxu1 %vm199_vm0, %v186_v19 }
  0x26   : > { %553 = vmatmul.mubr.msk.f32.gmra.mrb[6].mxu0 %vm199_vm0, %v179_v20 }
  0x27   : > { %565 = vmatmul.mubr.msk.f32.gmra.mrb[6].mxu1 %vm199_vm0, %v187_v21 }
  0xed   : > { %v545_v23 = vpop.f32.mrb[0].mxu0 }
  0xee   : > { %v557_v24 = vpop.f32.mrb[0].mxu1  ;;  %v320_v25 = vadd.f32 %v545_v23, %v492_v22  ;;  %v314_v27 = vpop.f32.mrb[1].mxu0 }
  0xef   : > { %v360_v26 = vadd.f32 %v557_v24, %v492_v22  ;;  %v354_v28 = vpop.f32.mrb[1].mxu1  ;;  %v315_v29 = vadd.f32 %v492_v22, %v314_v27 }
  0xf0   : > { %v355_v30 = vadd.f32 %v492_v22, %v354_v28  ;;  %394 = vst [vmem:[%s811_s20 + $0x8] sm:$0xff] %v320_v25 }
  0xf1   : > { %402 = vst [vmem:[%s811_s20 + $0x48] sm:$0xff] %v360_v26  ;;  %393 = vst [vmem:[%s811_s20] sm:$0xff] %v315_v29  ;;  %v548_v31 = vpop.f32.mrb[2].mxu0 }
  0xf2   : > { %401 = vst [vmem:[%s811_s20 + $0x40] sm:$0xff] %v355_v30  ;;  %v560_v32 = vpop.f32.mrb[2].mxu1  ;;  %v330_v33 = vadd.f32 %v548_v31, %v492_v22  ;;  %v324_v35 = vpop.f32.mrb[3].mxu0 }
  0xf3   : > { %v370_v34 = vadd.f32 %v560_v32, %v492_v22  ;;  %v364_v36 = vpop.f32.mrb[3].mxu1  ;;  %v325_v37 = vadd.f32 %v492_v22, %v324_v35 }
  0xf4   : > { %v365_v38 = vadd.f32 %v492_v22, %v364_v36  ;;  %396 = vst [vmem:[%s811_s20 + $0x18] sm:$0xff] %v330_v33 }
  0xf5   : > { %404 = vst [vmem:[%s811_s20 + $0x58] sm:$0xff] %v370_v34  ;;  %395 = vst [vmem:[%s811_s20 + $0x10] sm:$0xff] %v325_v37  ;;  %v551_v39 = vpop.f32.mrb[4].mxu0 }
  0xf6   : > { %403 = vst [vmem:[%s811_s20 + $0x50] sm:$0xff] %v365_v38  ;;  %v563_v40 = vpop.f32.mrb[4].mxu1  ;;  %v340_v41 = vadd.f32 %v551_v39, %v492_v22  ;;  %v334_v43 = vpop.f32.mrb[5].mxu0 }
  0xf7   : > { %v380_v42 = vadd.f32 %v563_v40, %v492_v22  ;;  %v374_v44 = vpop.f32.mrb[5].mxu1  ;;  %v335_v45 = vadd.f32 %v492_v22, %v334_v43 }
  0xf8   : > { %v375_v46 = vadd.f32 %v492_v22, %v374_v44  ;;  %398 = vst [vmem:[%s811_s20 + $0x28] sm:$0xff] %v340_v41 }
  0xf9   : > { %406 = vst [vmem:[%s811_s20 + $0x68] sm:$0xff] %v380_v42  ;;  %397 = vst [vmem:[%s811_s20 + $0x20] sm:$0xff] %v335_v45  ;;  %v554_v47 = vpop.f32.mrb[6].mxu0 }
  0xfa   : > { %405 = vst [vmem:[%s811_s20 + $0x60] sm:$0xff] %v375_v46  ;;  %v566_v48 = vpop.f32.mrb[6].mxu1  ;;  %v350_v49 = vadd.f32 %v554_v47, %v492_v22  ;;  %v344_v51 = vpop.f32.mrb[7].mxu0 }
  0xfb   : > { %v390_v50 = vadd.f32 %v566_v48, %v492_v22  ;;  %v384_v52 = vpop.f32.mrb[7].mxu1  ;;  %v345_v53 = vadd.f32 %v492_v22, %v344_v51 }
  0xfc   : > { %v385_v54 = vadd.f32 %v492_v22, %v384_v52  ;;  %400 = vst [vmem:[%s811_s20 + $0x38] sm:$0xff] %v350_v49 }
  0xfd   : > { %408 = vst [vmem:[%s811_s20 + $0x78] sm:$0xff] %v390_v50  ;;  %399 = vst [vmem:[%s811_s20 + $0x30] sm:$0xff] %v345_v53 }
  0xfe   : > { %407 = vst [vmem:[%s811_s20 + $0x70] sm:$0xff] %v385_v54 }
  0xff   : > { %633 = shalt.err (!%p630_p3)
}
 0x100   : > { %s634_s6 = scalar_lea.hbm %s830_s16, 2048  ;;  %s638_s9 = scalar_lea.hbm %s884_s3, 4096 }
 0x101   : > { %p635_p4 = scmp.ne.s32.totalorder %s830_s16, %s634_s6  ;;  %p639_p9 = scmp.lt.u32.totalorder %s830_s16, %s884_s3 }
 0x102   : > { %p640_p10 = scmp.lt.u32.totalorder %s638_s9, %s634_s6  ;;  %p642_p12 = scmp.lt.u32.totalorder %s634_s6, %s830_s16 }
 0x103   : > { %p636_p7 = pnand %p635_p4, %p745_p5 }
 0x104   : > { %p641_p11 = por %p640_p10, %p639_p9 }
 0x105   : > { %p637_p8 = pneg %p636_p7 }
 0x106   : > { %p643_p13 = por %p642_p12, %p641_p11 }
 0x108   : > { %p644_p0 = pnand %p643_p13, %p637_p8 }
 0x10a   : > { %647 = shalt.err (!%p644_p0)
}
 0x10b   : > { %s685_s17 = smov 128   ;;  %s686_s19 = smov 8  }
 0x10c   : > { %579 = dma.vmem_to_hbm [thread:$0]  (%p745_p5), %s832_s25, 2048, %s830_s16, %s840_s28, %s685_s17, %s685_s17, %s686_s19  }
 0x10d PF: > { %p585_p1 = scmp.ge.s32.totalorder %s682_s15, 2  ;;  %s438_s20 = sand.u32 1, %s670_s12  }
 0x10e   : > { %s439_s24 = scalar_lea.sflag [#allocation3], %s438_s20 }
 0x10f   : > { %p582_p2 = pnand %p585_p1, %p749_p6 }
 0x111   : > { %665 = dma.done.wait (!%p582_p2), %s439_s24, 2048  }
 0x112   : > { %667 = vsyncadd (!%p582_p2), %s439_s24, 4294965248  ;;  %p13_p3 = scmp.ge.s32.totalorder %s732_s18, 4   ;;  %s887_s12 = smov %s674_s13 }
 0x113   : > { %s888_s13 = smov %s678_s14  ;;  %s889_s14 = smov %s743_s21 }
 0x114   : > { %s890_s15 = smov %s732_s18  ;;  %15 = sbr.rel (!%p13_p3) target bundleno = 3 (0x3), region = 67 }
 0x11b   :  { %444 = vsyncpa [#allocation3], 1 }
 0x11c   :  { %446 = vsyncpa [#allocation3 + $0x1], 1 }

</bundles_post_ra>
